<compile_context>
chip_gen: v6e
topology: v6e:2x2x1
jax: 0.10.0
libtpu: 0.0.40
codegen_flags: <defaults>
</compile_context>

<pallas_src>
import functools

import jax
import jax.numpy as jnp
from jax.experimental import pallas as pl
from jax.experimental.pallas import tpu as pltpu

LANES = 128              # vreg lane width (same on v5e/v6e/v7x)
DEFAULT_TILE_ROWS = 2048  # 2048*128*4 B = 1 MiB per block


def linear_kernel(w_ref, b_ref, x_ref, o_ref):
    # w_ref, b_ref: (1, 1) f32 scalars in SMEM.
    # x_ref, o_ref: (tile_rows, 128) tiles in VMEM.
    w = w_ref[0, 0]
    b = b_ref[0, 0]
    # Pure VPU fused multiply-add over the whole lane-dense tile; no MXU.
    # Compute in f32 (bf16 inputs promote), store back in the output dtype.
    o_ref[...] = (x_ref[...] * w + b).astype(o_ref.dtype)


def _round_up(x, m):
    return ((x + m - 1) // m) * m


@functools.partial(jax.jit, static_argnames=("tile_rows",))
def linear_forward(x, weight, bias, *, tile_rows=DEFAULT_TILE_ROWS):
    """y = x @ weight.T + bias for nn.Linear(1, 1): x (N, 1) -> y (N, 1)."""
    n, in_f = x.shape
    out_f, in_f2 = weight.shape
    assert in_f == 1 and in_f2 == 1 and out_f == 1 and bias.shape == (1,)

    # Lane-dense layout: pack the N scalars into (rows, 128) with minimal
    # sublane-aligned padding (rows rounded up to a multiple of 8 -> at most
    # ~4 KiB of pad, never a full tile).
    rows = pl.cdiv(n, LANES)
    rows_padded = _round_up(rows, 8)
    total_padded = rows_padded * LANES

    # Tile sizing: big 1 MiB blocks for streaming; shrink for tiny N; and
    # ensure >= 2 grid steps when possible so both TensorCores get work on
    # megacore / v7x parts.  tr stays a multiple of 8 (sublane alignment).
    tr = min(tile_rows, rows_padded)
    if rows_padded >= 16 and tr > rows_padded // 2:
        tr = _round_up(rows_padded // 2, 8)
    tr = max(8, (tr // 8) * 8)

    # Only pad when actually needed (statically known): the aligned case does
    # zero extra HBM passes on the input.
    flat = x.reshape(-1)
    if total_padded != n:
        flat = jnp.pad(flat, (0, total_padded - n))
    x2d = flat.reshape(rows_padded, LANES)

    # f32 scalars resident in SMEM.
    w_smem = weight.reshape(1, 1).astype(jnp.float32)
    b_smem = bias.reshape(1, 1).astype(jnp.float32)

    grid = (pl.cdiv(rows_padded, tr),)  # ragged last block handled by Pallas

    y2d = pl.pallas_call(
        linear_kernel,
        out_shape=jax.ShapeDtypeStruct((rows_padded, LANES), x.dtype),
        grid=grid,
        in_specs=[
            # Scalars: whole (1,1) arrays resident in SMEM, read as w_ref[0,0].
            pl.BlockSpec(memory_space=pltpu.MemorySpace.SMEM),
            pl.BlockSpec(memory_space=pltpu.MemorySpace.SMEM),
            # Lane-dense x tiles streamed through VMEM (double-buffered).
            pl.BlockSpec((tr, LANES), lambda i: (i, 0)),
        ],
        out_specs=pl.BlockSpec((tr, LANES), lambda i: (i, 0)),
        compiler_params=pltpu.CompilerParams(
            dimension_semantics=("parallel",),
        ),
    )(w_smem, b_smem, x2d)

    # Only slice when padding was added; aligned case is a pure reshape.
    y_flat = y2d.reshape(-1)
    if total_padded != n:
        y_flat = y_flat[:n]
    return y_flat.reshape(n, out_f)


if __name__ == "__main__":
    key = jax.random.PRNGKey(0)
    kx, kw, kb = jax.random.split(key, 3)

    # Deterministic params matching nn.Linear(1, 1) shapes.
    # PyTorch default init is U(-1/sqrt(fan_in), 1/sqrt(fan_in)) = U(-1, 1) here.
    weight = jax.random.uniform(kw, (1, 1), jnp.float32, minval=-1.0, maxval=1.0)
    bias = jax.random.uniform(kb, (1,), jnp.float32, minval=-1.0, maxval=1.0)

    # Small example input, as nn.Linear(1, 1) expects: batch of 8 scalars.
    x = jax.random.normal(kx, (8, 1), jnp.float32)
    y = linear_forward(x, weight, bias)
    jax.block_until_ready(y)
    y_ref = x @ weight.T + bias
    assert y.shape == (8, 1)
    assert jnp.allclose(y, y_ref, atol=1e-6), "mismatch vs reference (small)"

    # Aligned path: no pad / no slice, and a >= 2-step parallel grid.
    x_big = jax.random.normal(kx, (4096, 1), jnp.float32)
    y_big = linear_forward(x_big, weight, bias)
    jax.block_until_ready(y_big)
    y_big_ref = x_big @ weight.T + bias
    assert y_big.shape == (4096, 1)
    assert jnp.allclose(y_big, y_big_ref, atol=1e-6), "mismatch vs reference (aligned)"

    # Unaligned path: minimal padding, discarded correctly.
    x_odd = jax.random.normal(kx, (1000, 1), jnp.float32)
    y_odd = linear_forward(x_odd, weight, bias)
    jax.block_until_ready(y_odd)
    y_odd_ref = x_odd @ weight.T + bias
    assert y_odd.shape == (1000, 1)
    assert jnp.allclose(y_odd, y_odd_ref, atol=1e-6), "mismatch vs reference (ragged)"

    print("KERNEL_OK")
</pallas_src>

<mosaic_0001>
module attributes {stable_mosaic.version = 11 : i64} {
  func.func @linear_kernel(%arg0: i32, %arg1: memref<1x1xf32, #tpu.memory_space<smem>>, %arg2: memref<1x1xf32, #tpu.memory_space<smem>>, %arg3: memref<8x128xf32, #tpu.memory_space<vmem>>, %arg4: memref<8x128xf32, #tpu.memory_space<vmem>>) attributes {dimension_semantics = [#tpu.dimension_semantics<parallel>], iteration_bounds = array<i64: 1>, scalar_prefetch = 0 : i64, scratch_operands = 0 : i64, tpu.core_type = #tpu.core_type<tc>, window_params = [{transform_indices = @transform_0, window_bounds = array<i64: 1, 1>}, {transform_indices = @transform_1, window_bounds = array<i64: 1, 1>}, {transform_indices = @transform_2, window_bounds = array<i64: 8, 128>}, {transform_indices = @transform_3, window_bounds = array<i64: 8, 128>}]} {
    %c0 = arith.constant 0 : index
    %c0_0 = arith.constant 0 : index
    %0 = memref.load %arg1[%c0, %c0_0] : memref<1x1xf32, #tpu.memory_space<smem>>
    %c0_1 = arith.constant 0 : index
    %c0_2 = arith.constant 0 : index
    %1 = memref.load %arg2[%c0_1, %c0_2] : memref<1x1xf32, #tpu.memory_space<smem>>
    %c0_3 = arith.constant 0 : index
    %c0_4 = arith.constant 0 : index
    %2 = vector.load %arg3[%c0_3, %c0_4] : memref<8x128xf32, #tpu.memory_space<vmem>>, vector<8x128xf32>
    %3 = vector.broadcast %0 : f32 to vector<8x128xf32>
    %4 = arith.mulf %2, %3 : vector<8x128xf32>
    %5 = vector.broadcast %1 : f32 to vector<8x128xf32>
    %6 = arith.addf %4, %5 : vector<8x128xf32>
    %c0_5 = arith.constant 0 : index
    %c0_6 = arith.constant 0 : index
    %7 = vector.load %arg4[%c0_5, %c0_6] : memref<8x128xf32, #tpu.memory_space<vmem>>, vector<8x128xf32>
    tpu.vector_store %arg4[%c0_5, %c0_6], %6 {strides = array<i32>} : memref<8x128xf32, #tpu.memory_space<vmem>>, vector<8x128xf32>,
    return
  }
  func.func @transform_0(%arg0: i32) -> (i32, i32) {
    %c0_i32 = arith.constant 0 : i32
    %c0_i32_0 = arith.constant 0 : i32
    %c0_i32_1 = arith.constant 0 : i32
    return %c0_i32, %c0_i32_0 : i32, i32
  }
  func.func @transform_1(%arg0: i32) -> (i32, i32) {
    %c0_i32 = arith.constant 0 : i32
    %c0_i32_0 = arith.constant 0 : i32
    %c0_i32_1 = arith.constant 0 : i32
    return %c0_i32, %c0_i32_0 : i32, i32
  }
  func.func @transform_2(%arg0: i32) -> (i32, i32) {
    %c0_i32 = arith.constant 0 : i32
    %c0_i32_0 = arith.constant 0 : i32
    return %arg0, %c0_i32 : i32, i32
  }
  func.func @transform_3(%arg0: i32) -> (i32, i32) {
    %c0_i32 = arith.constant 0 : i32
    %c0_i32_0 = arith.constant 0 : i32
    return %arg0, %c0_i32 : i32, i32
  }
}

</mosaic_0001>

<bundles_post_ra>
// kernel: linear_forward.1
= control target key start
LH: loop header
LB: loop body
LE: loop exit
PB: predicated region body
PF: predicated region fallthrough
CT: control target
= control target key end

     0   :  { %s60_s0 = inlined_call_operand.<no memory space> [shape: f32[1,1], index: 0, kind: input, shape index: {}]   ;;  %s61_s1 = inlined_call_operand.<no memory space> [shape: f32[1,1], index: 1, kind: input, shape index: {}]   ;;  %s62_s2 = inlined_call_operand.vmem [shape: f32[8,128], index: 2, kind: input, shape index: {}]   ;;  %s63_s3 = inlined_call_operand.vmem [shape: f32[8,128], index: 3, kind: output, shape index: {}]  }
   0x1   :  { %v18_v0 = vld [vmem:[%s62_s2] sm:$0xff]  ;;  %v19_v1 = vstv %s60_s0  ;;  %v21_v2 = vstv %s61_s1 }
   0x2   :  { %v20_v3 = vmul.f32 %v19_v1, %v18_v0 }
   0x4   :  { %v22_v4 = vadd.f32 %v21_v2, %v20_v3 }
   0x6   :  { %23 = vst [vmem:[%s63_s3] sm:$0xff] %v22_v4 }

</bundles_post_ra>
